<compile_context>
chip_gen: v7x
topology: tpu7x:2x2x1
jax: 0.10.0
libtpu: 0.0.40
codegen_flags: <defaults>
</compile_context>

<pallas_src>
import jax
import jax.numpy as jnp
from jax.experimental import pallas as pl
from jax.experimental.pallas import tpu as pltpu

LANE = 128
SUBLANE = 8
# Explicit scoped-VMEM budget: above the 16/32 MiB defaults, safely below v7x's 64 MiB physical.
_VMEM_LIMIT_BYTES = 48 * 1024 * 1024


def _round_up(x, m):
    return (x + m - 1) // m * m


def _largest_divisor_leq(n, cap):
    t = min(n, cap)
    while n % t:
        t -= 1
    return t


# ---------------------------------------------------------------------------
# Hoisted input projection:  gates_x = X @ W_ih^T + (b_ih + b_hh)   (one big GEMM)
# ---------------------------------------------------------------------------
def _proj_kernel(x_ref, w_ref, b_ref, o_ref):
    # x_ref: (tm, K) bf16, w_ref: (K, tn) bf16, b_ref: (1, tn) f32, o_ref: (tm, tn) f32
    o_ref[...] = (
        jnp.dot(x_ref[...], w_ref[...], preferred_element_type=jnp.float32)
        + b_ref[...]
    )


def input_projection(x2d, w_t, bias, *, tile_m=256, tile_n=512):
    """(M, K) bf16 @ (K, N) bf16 + bias -> (M, N) f32, tiled over (M, N)."""
    M, K = x2d.shape
    N = w_t.shape[1]
    Mp = _round_up(M, SUBLANE)
    if Mp != M:
        x2d = jnp.pad(x2d, ((0, Mp - M), (0, 0)))
    tm = _largest_divisor_leq(Mp, tile_m)
    tn = _largest_divisor_leq(N, tile_n)   # N = 4*Hp is a multiple of 512 -> MXU-friendly tiles
    out = pl.pallas_call(
        _proj_kernel,
        out_shape=jax.ShapeDtypeStruct((Mp, N), jnp.float32),
        grid_spec=pltpu.PrefetchScalarGridSpec(
            num_scalar_prefetch=0,
            grid=(Mp // tm, N // tn),
            in_specs=[
                pl.BlockSpec((tm, K), lambda i, j: (i, 0)),
                pl.BlockSpec((K, tn), lambda i, j: (0, j)),
                pl.BlockSpec((1, tn), lambda i, j: (0, j)),
            ],
            out_specs=pl.BlockSpec((tm, tn), lambda i, j: (i, j)),
        ),
        compiler_params=pltpu.CompilerParams(
            dimension_semantics=("parallel", "parallel"),
            vmem_limit_bytes=_VMEM_LIMIT_BYTES,
        ),
    )(x2d, w_t, bias)
    return out[:M] if Mp != M else out


# ---------------------------------------------------------------------------
# LSTM recurrence (time chunked; only the truly sequential h @ W_hh^T remains)
# ---------------------------------------------------------------------------
def _lstm_cell_step(gx_t, whh_vmem, h_scr, c_scr):
    """gx_t: (B, 4*Hp) f32 precomputed input gates for one step. Updates h/c scratch."""
    hp = h_scr.shape[-1]
    gates = gx_t + jnp.dot(
        h_scr[...].astype(jnp.bfloat16), whh_vmem[...],
        preferred_element_type=jnp.float32)                      # (B, 4*Hp), f32
    # PyTorch gate order i, f, g, o — each slice is a full 128-lane-aligned block.
    i_g = jax.nn.sigmoid(gates[:, 0 * hp:1 * hp])
    f_g = jax.nn.sigmoid(gates[:, 1 * hp:2 * hp])
    g_g = jnp.tanh(gates[:, 2 * hp:3 * hp])
    o_g = jax.nn.sigmoid(gates[:, 3 * hp:4 * hp])
    c_new = f_g * c_scr[...] + i_g * g_g
    h_new = o_g * jnp.tanh(c_new)
    c_scr[...] = c_new
    h_scr[...] = h_new
    return h_new


def _lstm_seq_kernel(gx_ref, whh_hbm, hseq_ref, whh_vmem, h_scr, c_scr):
    # gx_ref:   (Tc, B, 4*Hp) f32   precomputed input gates for this time chunk
    # whh_hbm:  (Hp, 4*Hp)   bf16   W_hh^T, raw HBM ref (copied once to scratch)
    # hseq_ref: (Tc, B, Hp)  bf16   hidden sequence output (input of next layer)
    c = pl.program_id(0)
    tc = gx_ref.shape[0]

    @pl.when(c == 0)
    def _():
        pltpu.sync_copy(whh_hbm, whh_vmem)       # load W_hh^T once; stays resident in scratch
        h_scr[...] = jnp.zeros_like(h_scr)
        c_scr[...] = jnp.zeros_like(c_scr)

    def step(i, carry):
        h_new = _lstm_cell_step(gx_ref[i], whh_vmem, h_scr, c_scr)
        hseq_ref[i] = h_new.astype(hseq_ref.dtype)
        return carry

    jax.lax.fori_loop(0, tc, step, 0, unroll=(tc <= 16))


def _lstm_last_fc_kernel(gx_ref, whh_hbm, fcw_ref, fcb_ref, out_ref,
                         whh_vmem, h_scr, c_scr):
    # Last LSTM layer: no hidden-sequence writeback; fuse the FC on the final hidden state.
    c = pl.program_id(0)
    tc = gx_ref.shape[0]

    @pl.when(c == 0)
    def _():
        pltpu.sync_copy(whh_hbm, whh_vmem)
        h_scr[...] = jnp.zeros_like(h_scr)
        c_scr[...] = jnp.zeros_like(c_scr)

    def step(i, carry):
        _lstm_cell_step(gx_ref[i], whh_vmem, h_scr, c_scr)
        return carry

    jax.lax.fori_loop(0, tc, step, 0, unroll=(tc <= 16))

    @pl.when(c == pl.num_programs(0) - 1)
    def _():
        # logits = hidden[-1] @ W_fc^T + b_fc, padded to 128 lanes (unmasked store).
        out_ref[...] = (
            jnp.dot(h_scr[...].astype(jnp.bfloat16), fcw_ref[...],
                    preferred_element_type=jnp.float32)
            + fcb_ref[...]
        )


def lstm_recurrence(gx, w_hh_t, *, time_chunk=64):
    """gx: (T, B, 4*Hp) f32 -> hidden sequence (T, B, Hp) bf16."""
    T, B, G = gx.shape
    hp = G // 4
    tc = _largest_divisor_leq(T, time_chunk)
    return pl.pallas_call(
        _lstm_seq_kernel,
        out_shape=jax.ShapeDtypeStruct((T, B, hp), jnp.bfloat16),
        grid_spec=pltpu.PrefetchScalarGridSpec(
            num_scalar_prefetch=0,
            grid=(T // tc,),
            in_specs=[
                pl.BlockSpec((tc, B, G), lambda c: (c, 0, 0)),
                pl.BlockSpec(memory_space=pl.ANY),            # W_hh^T stays in HBM
            ],
            out_specs=pl.BlockSpec((tc, B, hp), lambda c: (c, 0, 0)),
            scratch_shapes=[
                pltpu.VMEM((hp, G), jnp.bfloat16),            # resident W_hh^T (single copy)
                pltpu.VMEM((B, hp), jnp.float32),             # h state
                pltpu.VMEM((B, hp), jnp.float32),             # c state
            ],
        ),
        compiler_params=pltpu.CompilerParams(
            dimension_semantics=("arbitrary",),               # serial time axis, carried state
            vmem_limit_bytes=_VMEM_LIMIT_BYTES,
        ),
    )(gx, w_hh_t)


def lstm_recurrence_last_fc(gx, w_hh_t, fc_w_t, fc_b, *, time_chunk=64):
    """gx: (T, B, 4*Hp) f32 -> fused classifier output (B, Op) f32 from the final hidden."""
    T, B, G = gx.shape
    hp = G // 4
    op = fc_w_t.shape[1]
    tc = _largest_divisor_leq(T, time_chunk)
    return pl.pallas_call(
        _lstm_last_fc_kernel,
        out_shape=jax.ShapeDtypeStruct((B, op), jnp.float32),
        grid_spec=pltpu.PrefetchScalarGridSpec(
            num_scalar_prefetch=0,
            grid=(T // tc,),
            in_specs=[
                pl.BlockSpec((tc, B, G), lambda c: (c, 0, 0)),
                pl.BlockSpec(memory_space=pl.ANY),            # W_hh^T stays in HBM
                pl.BlockSpec((hp, op), lambda c: (0, 0)),     # FC W^T (bf16, tiny)
                pl.BlockSpec((1, op), lambda c: (0, 0)),      # FC bias (f32)
            ],
            out_specs=pl.BlockSpec((B, op), lambda c: (0, 0)),
            scratch_shapes=[
                pltpu.VMEM((hp, G), jnp.bfloat16),
                pltpu.VMEM((B, hp), jnp.float32),
                pltpu.VMEM((B, hp), jnp.float32),
            ],
        ),
        compiler_params=pltpu.CompilerParams(
            dimension_semantics=("arbitrary",),
            vmem_limit_bytes=_VMEM_LIMIT_BYTES,
        ),
    )(gx, w_hh_t, fc_w_t, fc_b)


# ---------------------------------------------------------------------------
# Full forward (mirrors RNN_LSTM.forward)
# ---------------------------------------------------------------------------
def rnn_lstm_forward(token_ids, params):
    """token_ids: (B, T) int32 (batch_first, like the PyTorch module)."""
    hp = params["hidden_padded"]
    # Embedding lookup done in plain JAX glue; only the tiny int32 id tensor is transposed
    # to time-major (the activation tensor never takes an extra transpose pass).
    # TODO(synk): the embedding row-gather has no clean rectangular Pallas tile expression.
    emb_t = jnp.take(params["embedding"], token_ids.T, axis=0)   # (T, B, E) bf16, time-major
    T, B, _ = emb_t.shape
    x2d = emb_t.reshape(T * B, emb_t.shape[-1])                  # bf16 MXU operand

    num_layers = len(params["lstm"])
    logits = None
    for li, layer in enumerate(params["lstm"]):
        # Hoisted input projection: one large GEMM over all time steps of this layer.
        gx = input_projection(x2d, layer["w_ih_t"], layer["b"])  # (T*B, 4*Hp) f32
        gx = gx.reshape(T, B, 4 * hp)
        if li < num_layers - 1:
            h_seq = lstm_recurrence(gx, layer["w_hh_t"])         # (T, B, Hp) bf16
            x2d = h_seq.reshape(T * B, hp)
        else:
            logits = lstm_recurrence_last_fc(
                gx, layer["w_hh_t"], params["fc_w_t"], params["fc_b"])   # (B, Op) f32

    out = logits[:, :params["output_dim"]]                       # drop lane padding
    return jnp.squeeze(out)                                      # torch.squeeze


# ---------------------------------------------------------------------------
# Parameter init (PyTorch-equivalent distributions, padded/packed for the kernels)
# ---------------------------------------------------------------------------
def _pad_gate_cols(w_t, h, hp):
    """(rows, 4*h) -> (rows, 4*hp): zero-pad each gate block to hp lanes (lane alignment)."""
    rows = w_t.shape[0]
    w4 = w_t.reshape(rows, 4, h)
    w4 = jnp.pad(w4, ((0, 0), (0, 0), (0, hp - h)))
    return w4.reshape(rows, 4 * hp)


def init_params(key, input_dim, embedding_dim, hidden_dim, num_layers, output_dim):
    hp = _round_up(hidden_dim, LANE)
    op = _round_up(output_dim, LANE)
    keys = jax.random.split(key, 3 + 4 * num_layers)
    k_it = iter(keys)
    params = {"hidden_padded": hp, "output_padded": op, "output_dim": output_dim}

    # nn.Embedding: N(0, 1), shape (input_dim + 1, E); stored bf16 (MXU operand dtype).
    params["embedding"] = jax.random.normal(
        next(k_it), (input_dim + 1, embedding_dim), jnp.float32
    ).astype(jnp.bfloat16)

    # nn.LSTM: uniform(-1/sqrt(H), 1/sqrt(H)); gate order i, f, g, o.
    bound = float(1.0 / (hidden_dim ** 0.5))
    layers = []
    for l in range(num_layers):
        in_dim = embedding_dim if l == 0 else hidden_dim
        in_dim_p = embedding_dim if l == 0 else hp
        w_ih = jax.random.uniform(next(k_it), (4 * hidden_dim, in_dim),
                                  jnp.float32, -bound, bound)
        w_hh = jax.random.uniform(next(k_it), (4 * hidden_dim, hidden_dim),
                                  jnp.float32, -bound, bound)
        b_ih = jax.random.uniform(next(k_it), (4 * hidden_dim,),
                                  jnp.float32, -bound, bound)
        b_hh = jax.random.uniform(next(k_it), (4 * hidden_dim,),
                                  jnp.float32, -bound, bound)

        w_ih_t = _pad_gate_cols(w_ih.T, hidden_dim, hp)                     # (in_dim, 4*hp)
        w_ih_t = jnp.pad(w_ih_t, ((0, in_dim_p - in_dim), (0, 0)))          # (in_dim_p, 4*hp)
        w_hh_t = _pad_gate_cols(w_hh.T, hidden_dim, hp)                     # (H, 4*hp)
        w_hh_t = jnp.pad(w_hh_t, ((0, hp - hidden_dim), (0, 0)))            # (hp, 4*hp)
        b_sum = _pad_gate_cols((b_ih + b_hh).reshape(1, 4 * hidden_dim),
                               hidden_dim, hp)                              # (1, 4*hp)
        layers.append({
            "w_ih_t": w_ih_t.astype(jnp.bfloat16),
            "w_hh_t": w_hh_t.astype(jnp.bfloat16),
            "b": b_sum.astype(jnp.float32),
        })
    params["lstm"] = layers

    # nn.Linear(hidden_dim, output_dim): uniform(-1/sqrt(H), 1/sqrt(H)); padded to (hp, op).
    fc_w = jax.random.uniform(next(k_it), (output_dim, hidden_dim),
                              jnp.float32, -bound, bound)
    fc_b = jax.random.uniform(next(k_it), (output_dim,), jnp.float32, -bound, bound)
    params["fc_w_t"] = jnp.pad(
        fc_w.T, ((0, hp - hidden_dim), (0, op - output_dim))).astype(jnp.bfloat16)
    params["fc_b"] = jnp.pad(fc_b, (0, op - output_dim)).reshape(1, op).astype(jnp.float32)
    return params


# ---------------------------------------------------------------------------
# Plain-JAX reference (same padded bf16 weights, f32 math) for a sanity check
# ---------------------------------------------------------------------------
def _reference_forward(token_ids, params):
    hp = params["hidden_padded"]
    emb = jnp.take(params["embedding"].astype(jnp.float32), token_ids, axis=0)  # (B, T, E)
    B, T, _ = emb.shape
    x = emb
    h = None
    for layer in params["lstm"]:
        w_ih_t = layer["w_ih_t"].astype(jnp.float32)
        w_hh_t = layer["w_hh_t"].astype(jnp.float32)
        b = layer["b"]
        h = jnp.zeros((B, hp), jnp.float32)
        c = jnp.zeros((B, hp), jnp.float32)
        outs = []
        for t in range(T):
            gates = x[:, t, :] @ w_ih_t + h @ w_hh_t + b
            i_g = jax.nn.sigmoid(gates[:, 0 * hp:1 * hp])
            f_g = jax.nn.sigmoid(gates[:, 1 * hp:2 * hp])
            g_g = jnp.tanh(gates[:, 2 * hp:3 * hp])
            o_g = jax.nn.sigmoid(gates[:, 3 * hp:4 * hp])
            c = f_g * c + i_g * g_g
            h = o_g * jnp.tanh(c)
            outs.append(h)
        x = jnp.stack(outs, axis=1)
    logits = h @ params["fc_w_t"].astype(jnp.float32) + params["fc_b"]
    return jnp.squeeze(logits[:, :params["output_dim"]])


if __name__ == "__main__":
    # Small shapes consistent with the module
    input_dim = 50        # vocab size (embedding has input_dim + 1 rows)
    embedding_dim = 32
    hidden_dim = 32
    num_layers = 2
    output_dim = 4
    batch = 2
    seq = 8

    key = jax.random.PRNGKey(0)
    k_params, k_tokens = jax.random.split(key)
    params = init_params(k_params, input_dim, embedding_dim,
                         hidden_dim, num_layers, output_dim)
    token_ids = jax.random.randint(k_tokens, (batch, seq), 0, input_dim + 1,
                                   dtype=jnp.int32)

    out = rnn_lstm_forward(token_ids, params)
    jax.block_until_ready(out)
    assert out.shape == (batch, output_dim), out.shape

    ref = _reference_forward(token_ids, params)
    max_err = float(jnp.max(jnp.abs(out - ref)))
    assert max_err < 5e-2, f"mismatch vs reference: {max_err}"

    print("KERNEL_OK")
</pallas_src>

<mosaic_0001>
module attributes {stable_mosaic.version = 11 : i64} {
  func.func @_proj_kernel(%arg0: i32, %arg1: i32, %arg2: memref<16x32xbf16, #tpu.memory_space<vmem>>, %arg3: memref<32x512xbf16, #tpu.memory_space<vmem>>, %arg4: memref<1x512xf32, #tpu.memory_space<vmem>>, %arg5: memref<16x512xf32, #tpu.memory_space<vmem>>) attributes {dimension_semantics = [#tpu.dimension_semantics<parallel>, #tpu.dimension_semantics<parallel>], iteration_bounds = array<i64: 1, 1>, scalar_prefetch = 0 : i64, scratch_operands = 0 : i64, tpu.core_type = #tpu.core_type<tc>, window_params = [{transform_indices = @transform_0, window_bounds = array<i64: 16, 32>}, {transform_indices = @transform_1, window_bounds = array<i64: 32, 512>}, {transform_indices = @transform_2, window_bounds = array<i64: 1, 512>}, {transform_indices = @transform_3, window_bounds = array<i64: 16, 512>}]} {
    %c0 = arith.constant 0 : index
    %c0_0 = arith.constant 0 : index
    %0 = vector.load %arg2[%c0, %c0_0] : memref<16x32xbf16, #tpu.memory_space<vmem>>, vector<16x32xbf16>
    %c0_1 = arith.constant 0 : index
    %c0_2 = arith.constant 0 : index
    %1 = vector.load %arg3[%c0_1, %c0_2] : memref<32x512xbf16, #tpu.memory_space<vmem>>, vector<32x512xbf16>
    %cst = arith.constant dense<0.000000e+00> : vector<16x512xf32>
    %2 = tpu.matmul %0, %1, %cst {dimension_numbers = #tpu.dot_dimension_numbers<[1], [0], [0], [1], [0, 0, 1, 1], [], []>} : vector<16x32xbf16>, vector<32x512xbf16>, vector<16x512xf32> -> vector<16x512xf32>
    %c0_3 = arith.constant 0 : index
    %c0_4 = arith.constant 0 : index
    %3 = vector.load %arg4[%c0_3, %c0_4] : memref<1x512xf32, #tpu.memory_space<vmem>>, vector<1x512xf32>
    %4 = vector.broadcast %3 : vector<1x512xf32> to vector<16x512xf32>
    %5 = arith.addf %2, %4 : vector<16x512xf32>
    %c0_5 = arith.constant 0 : index
    %c0_6 = arith.constant 0 : index
    %6 = vector.load %arg5[%c0_5, %c0_6] : memref<16x512xf32, #tpu.memory_space<vmem>>, vector<16x512xf32>
    tpu.vector_store %arg5[%c0_5, %c0_6], %5 {strides = array<i32>} : memref<16x512xf32, #tpu.memory_space<vmem>>, vector<16x512xf32>,
    return
  }
  func.func @transform_0(%arg0: i32, %arg1: i32) -> (i32, i32) {
    %c0_i32 = arith.constant 0 : i32
    %c0_i32_0 = arith.constant 0 : i32
    return %arg0, %c0_i32 : i32, i32
  }
  func.func @transform_1(%arg0: i32, %arg1: i32) -> (i32, i32) {
    %c0_i32 = arith.constant 0 : i32
    %c0_i32_0 = arith.constant 0 : i32
    return %c0_i32, %arg1 : i32, i32
  }
  func.func @transform_2(%arg0: i32, %arg1: i32) -> (i32, i32) {
    %c0_i32 = arith.constant 0 : i32
    %c0_i32_0 = arith.constant 0 : i32
    return %c0_i32, %arg1 : i32, i32
  }
  func.func @transform_3(%arg0: i32, %arg1: i32) -> (i32, i32) {
    %c0_i32 = arith.constant 0 : i32
    return %arg0, %arg1 : i32, i32
  }
}

</mosaic_0001>

<bundles_post_ra>
// kernel: tpu_custom_call.1
= control target key start
LH: loop header
LB: loop body
LE: loop exit
PB: predicated region body
PF: predicated region fallthrough
CT: control target
= control target key end

     0   :  { %8 = vsyncpa [#allocation3], 0  ;;  %s412_s0 = inlined_call_operand.hbm [shape: bf16[16,32], index: 0, kind: input, shape index: {}]   ;;  %s413_s1 = inlined_call_operand.hbm [shape: bf16[32,512], index: 1, kind: input, shape index: {}]   ;;  %s414_s2 = inlined_call_operand.vmem [shape: f32[1,512], index: 2, kind: input, shape index: {}]   ;;  %s415_s3 = inlined_call_operand.hbm [shape: f32[16,512], index: 3, kind: output, shape index: {}]  }
   0x1   :  { %9 = vsyncpa [#allocation6], 0 }
   0x2   :  { %10 = vsyncpa [#allocation4], 0  ;;  %s343_s12 = smov [#allocation2]   ;;  %s271_s16 = scalar_lea.hbm %s412_s0, 128 }
   0x3   :  { %s16_s13 = sshll.u32 %s343_s12, 4  ;;  %p272_p0 = scmp.ne.s32.totalorder %s412_s0, %s271_s16  ;;  %s17_s13 = int_to_ptr.vmem [resolvable:$true] %s16_s13 }
   0x4   :  { %p275_p1 = scmp.lt.u32.totalorder %s271_s16, %s412_s0 }
   0x6   :  { %p277_p2 = pnand %p275_p1, %p272_p0 }
   0x8   :  { %280 = shalt.err (!%p277_p2)
}
   0x9   :  { %s281_s21 = scalar_lea.vmem %s17_s13, 128  ;;  %p286_p4 = scmp.lt.s32.totalorder %s17_s13, %s17_s13 }
   0xa   :  { %p282_p3 = scmp.ne.s32.totalorder %s17_s13, %s281_s21  ;;  %p287_p5 = scmp.lt.s32.totalorder %s281_s21, %s281_s21 }
   0xc   :  { %p288_p6 = por %p287_p5, %p286_p4 }
   0xe   :  { %p289_p7 = pnand %p288_p6, %p282_p3 }
  0x10   :  { %292 = shalt.err (!%p289_p7)
}
  0x11   :  { %s344_s22 = smov 64   ;;  %s345_s23 = smov 4  }
  0x12   :  { %22 = dma.hbm_to_vmem [thread:$0]  %s412_s0, 128, %s17_s13, [#allocation3], %s344_s22, %s344_s22, %s345_s23  }
  0x13   :  { %s346_s26 = smov [#allocation5]   ;;  %s293_s30 = scalar_lea.hbm %s413_s1, 1024 }
  0x14   :  { %s28_s27 = sshll.u32 %s346_s26, 4  ;;  %p294_p8 = scmp.ne.s32.totalorder %s413_s1, %s293_s30  ;;  %s29_s27 = int_to_ptr.vmem [resolvable:$true] %s28_s27 }
  0x15   :  { %p297_p9 = scmp.lt.u32.totalorder %s293_s30, %s413_s1 }
  0x17   :  { %p299_p10 = pnand %p297_p9, %p294_p8 }
  0x19   :  { %302 = shalt.err (!%p299_p10)
}
  0x1a   :  { %s303_s8 = scalar_lea.vmem %s29_s27, 1024  ;;  %p308_p12 = scmp.lt.s32.totalorder %s29_s27, %s29_s27 }
  0x1b   :  { %p304_p11 = scmp.ne.s32.totalorder %s29_s27, %s303_s8  ;;  %p309_p13 = scmp.lt.s32.totalorder %s303_s8, %s303_s8 }
  0x1d   :  { %p310_p0 = por %p309_p13, %p308_p12 }
  0x1f   :  { %p311_p1 = pnand %p310_p0, %p304_p11 }
  0x21   :  { %314 = shalt.err (!%p311_p1)
}
  0x22   :  { %s347_s0 = smov 256   ;;  %s348_s9 = smov 16  }
  0x23   :  { %34 = dma.hbm_to_vmem [thread:$0]  %s413_s1, 1024, %s29_s27, [#allocation6], %s347_s0, %s347_s0, %s348_s9  }
  0x24   :  { %337 = dma.done.wait [#allocation3], 128  }
  0x25   :  { %338 = vsyncadd [#allocation3], 4294967168 }
  0x26   :  { %339 = dma.done.wait [#allocation6], 1024  }
  0x27   :  { %340 = vsyncadd [#allocation6], 4294966272  ;;  %v349_v0 = vmov 0   ;;  %v258_v1 = vld [vmem:[#allocation5 + $0x4] ss:$16 sps:$4 sm:$0xff]   ;;  %v270_v9 = vld [vmem:[#allocation2] sm:$0xff]   ;;  %v56_v10 = vlaneseq }
  0x28   :  { %157 = vmatprep.mubr.bf16.mxu0 %v349_v0  ;;  %200 = vmatprep.mubr.bf16.mxu1 %v349_v0  ;;  %v260_v2 = vld [vmem:[#allocation5 + $0xc] ss:$16 sps:$4 sm:$0xff]   ;;  %v262_v3 = vld [vmem:[#allocation5] ss:$16 sps:$4 sm:$0xff]   ;;  %v263_v4 = vld [vmem:[#allocation5 + $0x8] ss:$16 sps:$4 sm:$0xff]  }
  0x29   :  { %125 = vmatprep.subr.bf16.mxu0 %v258_v1  ;;  %168 = vmatprep.subr.bf16.mxu1 %v260_v2  ;;  %v264_v5 = vld [vmem:[#allocation5 + $0x24] ss:$16 sps:$4 sm:$0xff]   ;;  %v266_v6 = vld [vmem:[#allocation5 + $0x2c] ss:$16 sps:$4 sm:$0xff]   ;;  %v268_v7 = vld [vmem:[#allocation5 + $0x20] ss:$16 sps:$4 sm:$0xff]  }
  0x2a   :  { %126 = vmatpush1.bf16.msra.mxu0 %v262_v3  ;;  %169 = vmatpush1.bf16.msra.mxu1 %v263_v4  ;;  %v269_v8 = vld [vmem:[#allocation5 + $0x28] ss:$16 sps:$4 sm:$0xff]   ;;  %vm121_vm0 = vcmask 261120   ;;  %v57_v11 = vshrl.u32 %v56_v10, 7  ;;  %s350_s13 = smov [#allocation7]  }
  0x2b   :  { %127 = vmatprep.subr.bf16.mxu0 %v264_v5  ;;  %170 = vmatprep.subr.bf16.mxu1 %v266_v6  ;;  %v54_v14 = vld [vmem:[%s414_s2] sm:$0xf]  ;;  %s224_s14 = sshll.u32 %s350_s13, 4  ;;  %s225_s14 = int_to_ptr.vmem [resolvable:$true] %s224_s14 }
  0x2c   :  { %v58_v12 = vsub.s32 0, %v57_v11  ;;  %v66_v13 = vsub.s32 2, %v57_v11  ;;  %v62_v15 = vsub.s32 1, %v57_v11  ;;  %v70_v16 = vsub.s32 3, %v57_v11  ;;  %s315_s2 = scalar_lea.vmem %s225_s14, 1024  ;;  %p320_p3 = scmp.lt.s32.totalorder %s225_s14, %s225_s14 }
  0x2d   :  { %p316_p2 = scmp.ne.s32.totalorder %s225_s14, %s315_s2  ;;  %p321_p4 = scmp.lt.s32.totalorder %s315_s2, %s315_s2 }
  0x2e   :  { %128 = vmatpush1.bf16.msra.mxu0 %v268_v7  ;;  %171 = vmatpush1.bf16.msra.mxu1 %v269_v8  ;;  %v59_v17 = vrot.slane %v54_v14, %v58_v12  ;;  %v67_v18 = vrot.slane %v54_v14, %v66_v13  ;;  %v63_v19 = vrot.slane %v54_v14, %v62_v15 }
  0x2f   :  { %v71_v20 = vrot.slane %v54_v14, %v70_v16  ;;  %p322_p5 = por %p321_p4, %p320_p3 }
  0x31   :  { %246 = vmatmul.mubr.msk.bf16.vlgmr.msra.gmra.mrb[0].mxu0 %vm121_vm0, %v270_v9  ;;  %247 = vmatmul.mubr.msk.bf16.vlgmr.msra.gmra.mrb[0].mxu1 %vm121_vm0, %v270_v9  ;;  %p323_p6 = pnand %p322_p5, %p316_p2 }
 0x104   :  { %v159_v21 = vpop.f32.mrb[0].mxu0  ;;  %v202_v22 = vpop.f32.mrb[0].mxu1 }
 0x105   :  { %v160_v23 = vadd.f32 %v159_v21, %v59_v17  ;;  %v203_v24 = vadd.f32 %v202_v22, %v67_v18  ;;  %v161_v25 = vpop.f32.mrb[1].mxu0  ;;  %v204_v26 = vpop.f32.mrb[1].mxu1 }
 0x106   :  { %v162_v27 = vadd.f32 %v161_v25, %v63_v19  ;;  %v205_v28 = vadd.f32 %v204_v26, %v71_v20  ;;  %v163_v29 = vpop.f32.mrb[2].mxu0  ;;  %v206_v30 = vpop.f32.mrb[2].mxu1 }
 0x107   :  { %211 = vst [vmem:[#allocation7] sm:$0xff] %v160_v23  ;;  %213 = vst [vmem:[#allocation7 + $0x10] sm:$0xff] %v203_v24  ;;  %v164_v31 = vadd.f32 %v163_v29, %v59_v17  ;;  %v207_v32 = vadd.f32 %v206_v30, %v67_v18  ;;  %v165_v33 = vpop.f32.mrb[3].mxu0  ;;  %v208_v34 = vpop.f32.mrb[3].mxu1 }
 0x108   :  { %212 = vst [vmem:[#allocation7 + $0x8] sm:$0xff] %v162_v27  ;;  %214 = vst [vmem:[#allocation7 + $0x18] sm:$0xff] %v205_v28  ;;  %v166_v35 = vadd.f32 %v165_v33, %v63_v19  ;;  %v209_v36 = vadd.f32 %v208_v34, %v71_v20 }
 0x109   :  { %215 = vst [vmem:[#allocation7 + $0x20] sm:$0xff] %v164_v31  ;;  %217 = vst [vmem:[#allocation7 + $0x30] sm:$0xff] %v207_v32 }
 0x10a   :  { %216 = vst [vmem:[#allocation7 + $0x28] sm:$0xff] %v166_v35  ;;  %218 = vst [vmem:[#allocation7 + $0x38] sm:$0xff] %v209_v36 }
 0x10b   :  { %326 = shalt.err (!%p323_p6)
}
 0x10c   :  { %s327_s17 = scalar_lea.hbm %s415_s3, 1024 }
 0x10d   :  { %p328_p7 = scmp.ne.s32.totalorder %s415_s3, %s327_s17  ;;  %p331_p8 = scmp.lt.u32.totalorder %s327_s17, %s415_s3 }
 0x10f   :  { %p333_p9 = pnand %p331_p8, %p328_p7 }
 0x111   :  { %336 = shalt.err (!%p333_p9)
}
 0x112   :  { %s351_s22 = smov 512   ;;  %s352_s23 = smov 32  }
 0x113   :  { %230 = dma.vmem_to_hbm [thread:$0]  %s225_s14, 1024, %s415_s3, [#allocation4], %s351_s22, %s351_s22, %s352_s23  }
 0x114   :  { %341 = dma.done.wait [#allocation4], 1024  }
 0x115   :  { %342 = vsyncadd [#allocation4], 4294966272 }
 0x116   :  { %234 = vsyncpa [#allocation3], 1 }
 0x117   :  { %235 = vsyncpa [#allocation6], 1 }
 0x118   :  { %236 = vsyncpa [#allocation4], 1 }

</bundles_post_ra>
